<compile_context>
chip_gen: v6e
topology: v6e:2x2x1
jax: 0.10.0
libtpu: 0.0.40
codegen_flags: <defaults>
</compile_context>

<pallas_src>
import math

import jax
import jax.numpy as jnp
from jax import lax
from jax.experimental import pallas as pl
from jax.experimental.pallas import tpu as pltpu


NEG_SLOPE = 0.01  # torch.nn.LeakyReLU default


def _leaky_relu(v):
    return jnp.where(v > 0, v, NEG_SLOPE * v)


def _round_up(n, m):
    return -(-n // m) * m


def mlp_kernel(x_ref, w_ref, b_ref, o_ref):
    # x_ref: [32, tb]  (feature-major activations, batch on lanes)
    # w_ref: [104, 32] packed weights  (rows: W1 | W2 | W3 | W4 zero-padded to 8)
    # b_ref: [32, 4]   packed biases   (cols: b1 | b2 | b3 | b4 zero-padded)
    # o_ref: [8, tb]   (rows 0:3 are the real outputs)
    x = x_ref[...]
    w = w_ref[...]
    b = b_ref[...]

    w1 = w[0:32, :]
    w2 = w[32:64, :]
    w3 = w[64:96, :]
    w4 = w[96:104, :]
    b1 = b[:, 0:1]
    b2 = b[:, 1:2]
    b3 = b[:, 2:3]
    b4 = b[0:8, 3:4]

    # h = W @ x : MXU N dimension == tb lanes (fully fed).
    h = _leaky_relu(jnp.dot(w1, x, preferred_element_type=jnp.float32) + b1)
    h = _leaky_relu(jnp.dot(w2, h, preferred_element_type=jnp.float32) + b2)
    h = _leaky_relu(jnp.dot(w3, h, preferred_element_type=jnp.float32) + b3)
    o_ref[...] = _leaky_relu(
        jnp.dot(w4, h, preferred_element_type=jnp.float32) + b4)


def mlp_pallas(x, params, *, tb=16384):
    """x: [32, B] f32 feature-major activations. Returns [B, 3] f32."""
    B = x.shape[1]

    if B <= tb:
        Bp = _round_up(B, 128)
        tb_eff = Bp
        # Keep >=2 grid steps on moderately large batches so both v7x
        # TensorCores get work (harmless on single-TC v5e/v6e).
        if Bp >= 2048 and (Bp // 2) % 128 == 0:
            tb_eff = Bp // 2
    else:
        Bp = _round_up(B, tb)
        tb_eff = tb

    pad = Bp - B
    if pad:
        x = jnp.pad(x, ((0, 0), (0, pad)))

    grid = (Bp // tb_eff,)

    flops = 2 * Bp * (3 * 32 * 32 + 8 * 32)
    bytes_accessed = 4 * (Bp * (32 + 8) + 104 * 32 + 32 * 4)
    cost = pl.CostEstimate(flops=flops, transcendentals=0,
                           bytes_accessed=bytes_accessed)

    out = pl.pallas_call(
        mlp_kernel,
        out_shape=jax.ShapeDtypeStruct((8, Bp), jnp.float32),
        grid=grid,
        in_specs=[
            pl.BlockSpec((32, tb_eff), lambda i: (0, i)),   # activations
            pl.BlockSpec((104, 32), lambda i: (0, 0)),      # weight slab (VMEM-resident)
            pl.BlockSpec((32, 4), lambda i: (0, 0)),        # bias slab (VMEM-resident)
        ],
        out_specs=pl.BlockSpec((8, tb_eff), lambda i: (0, i)),
        compiler_params=pltpu.CompilerParams(
            dimension_semantics=("parallel",)),
        cost_estimate=cost,
    )(x, params["w_slab"], params["b_slab"])

    # Drop padded output rows/lanes, back to batch-major.
    return out[:3, :B].T


def kaiming_uniform(key, shape, fan_in, neg_slope=NEG_SLOPE):
    # PyTorch kaiming_uniform_ with nonlinearity='leaky_relu'
    gain = math.sqrt(2.0 / (1.0 + neg_slope ** 2))
    bound = gain * math.sqrt(3.0 / fan_in)
    return jax.random.uniform(key, shape, jnp.float32, -bound, bound)


def init_params(key):
    keys = jax.random.split(key, 11)
    emb_H = kaiming_uniform(keys[0], (400, 8), 8)
    emb_D = kaiming_uniform(keys[1], (400, 8), 8)
    emb_U = kaiming_uniform(keys[2], (160000, 16), 16)

    # Linear: PyTorch stores W as [out, in]; kept that way since the kernel
    # computes h = W @ x (feature-major).
    def linear(kw, kb, fan_in, fan_out):
        w = kaiming_uniform(kw, (fan_out, fan_in), fan_in)
        bb = 1.0 / math.sqrt(fan_in)
        b = jax.random.uniform(kb, (fan_out,), jnp.float32, -bb, bb)
        return w, b

    w1, b1 = linear(keys[3], keys[4], 32, 32)
    w2, b2 = linear(keys[5], keys[6], 32, 32)
    w3, b3 = linear(keys[7], keys[8], 32, 32)
    w4, b4 = linear(keys[9], keys[10], 32, 3)

    # Kernel-side packed constant slabs.
    w4p = jnp.zeros((8, 32), jnp.float32).at[:3].set(w4)   # pad out dim 3 -> 8
    w_slab = jnp.concatenate([w1, w2, w3, w4p], axis=0)    # [104, 32]
    b4p = jnp.zeros((32,), jnp.float32).at[:3].set(b4)
    b_slab = jnp.stack([b1, b2, b3, b4p], axis=1)          # [32, 4]

    return dict(
        emb_H=emb_H, emb_D=emb_D, emb_U=emb_U,
        w1=w1, b1=b1, w2=w2, b2=b2, w3=w3, b3=b3, w4=w4, b4=b4,
        w_slab=w_slab, b_slab=b_slab)


def mlp_forward(X, params):
    """X: [..., 3] int32 indices (h, d, u). Returns [..., 3] f32."""
    h = X[..., 0]
    d = X[..., 1]
    u = X[..., 2]
    lead_shape = h.shape
    # TODO(synk): embedding gathers stay in the XLA wrapper (jnp.take); a
    # data-dependent in-kernel gather would need manual DMA for no gain here.
    fH = jnp.take(params["emb_H"], h.reshape(-1), axis=0)   # [B, 8]
    fD = jnp.take(params["emb_D"], d.reshape(-1), axis=0)   # [B, 8]
    fU = jnp.take(params["emb_U"], u.reshape(-1), axis=0)   # [B, 16]
    # Single fused activation slab, feature-major (D|H|U matches torch.cat).
    feats = jnp.concatenate([fD, fH, fU], axis=-1).astype(jnp.float32)  # [B,32]
    out = mlp_pallas(feats.T, params)                                   # [B, 3]
    return out.reshape(lead_shape + (3,))


def reference_forward(X, params):
    """Pure-JAX reference (mirrors the PyTorch forward)."""
    h = X[..., 0]; d = X[..., 1]; u = X[..., 2]
    feats = jnp.concatenate(
        (params["emb_D"][d], params["emb_H"][h], params["emb_U"][u]),
        axis=-1).astype(jnp.float32)
    dot = lambda a, w: jnp.dot(a, w.T, precision=lax.Precision.HIGHEST)
    x = _leaky_relu(dot(feats, params["w1"]) + params["b1"])
    x = _leaky_relu(dot(x, params["w2"]) + params["b2"])
    x = _leaky_relu(dot(x, params["w3"]) + params["b3"])
    x = _leaky_relu(dot(x, params["w4"]) + params["b4"])
    return x


if __name__ == "__main__":
    key = jax.random.PRNGKey(0)
    pkey, xkey = jax.random.split(key)
    params = init_params(pkey)

    B = 8
    kh, kd, ku = jax.random.split(xkey, 3)
    X = jnp.stack([
        jax.random.randint(kh, (B,), 0, 400),
        jax.random.randint(kd, (B,), 0, 400),
        jax.random.randint(ku, (B,), 0, 160000),
    ], axis=-1).astype(jnp.int32)                       # [B, 3]

    out = mlp_forward(X, params)
    out = jax.block_until_ready(out)

    ref = reference_forward(X, params)
    assert out.shape == (B, 3)
    assert jnp.allclose(out, ref, atol=1e-4, rtol=1e-4)

    print("KERNEL_OK")
</pallas_src>

<mosaic_0001>
module attributes {stable_mosaic.version = 11 : i64} {
  func.func @mlp_kernel(%arg0: i32, %arg1: memref<32x128xf32, #tpu.memory_space<vmem>>, %arg2: memref<104x32xf32, #tpu.memory_space<vmem>>, %arg3: memref<32x4xf32, #tpu.memory_space<vmem>>, %arg4: memref<8x128xf32, #tpu.memory_space<vmem>>) attributes {dimension_semantics = [#tpu.dimension_semantics<parallel>], iteration_bounds = array<i64: 1>, scalar_prefetch = 0 : i64, scratch_operands = 0 : i64, tpu.core_type = #tpu.core_type<tc>, window_params = [{transform_indices = @transform_0, window_bounds = array<i64: 32, 128>}, {pipeline_mode = #tpu.pipeline_mode<synchronous>, transform_indices = @transform_1, window_bounds = array<i64: 104, 32>}, {pipeline_mode = #tpu.pipeline_mode<synchronous>, transform_indices = @transform_2, window_bounds = array<i64: 32, 4>}, {transform_indices = @transform_3, window_bounds = array<i64: 8, 128>}]} {
    %c0 = arith.constant 0 : index
    %c0_0 = arith.constant 0 : index
    %0 = vector.load %arg1[%c0, %c0_0] : memref<32x128xf32, #tpu.memory_space<vmem>>, vector<32x128xf32>
    %c0_1 = arith.constant 0 : index
    %c0_2 = arith.constant 0 : index
    %1 = vector.load %arg2[%c0_1, %c0_2] : memref<104x32xf32, #tpu.memory_space<vmem>>, vector<104x32xf32>
    %c0_3 = arith.constant 0 : index
    %c0_4 = arith.constant 0 : index
    %2 = vector.load %arg3[%c0_3, %c0_4] : memref<32x4xf32, #tpu.memory_space<vmem>>, vector<32x4xf32>
    %3 = vector.extract_strided_slice %1 {offsets = [0, 0], sizes = [32, 32], strides = [1, 1]} : vector<104x32xf32> to vector<32x32xf32>
    %4 = vector.extract_strided_slice %1 {offsets = [32, 0], sizes = [32, 32], strides = [1, 1]} : vector<104x32xf32> to vector<32x32xf32>
    %5 = vector.extract_strided_slice %1 {offsets = [64, 0], sizes = [32, 32], strides = [1, 1]} : vector<104x32xf32> to vector<32x32xf32>
    %6 = vector.extract_strided_slice %1 {offsets = [96, 0], sizes = [8, 32], strides = [1, 1]} : vector<104x32xf32> to vector<8x32xf32>
    %7 = vector.extract_strided_slice %2 {offsets = [0, 0], sizes = [32, 1], strides = [1, 1]} : vector<32x4xf32> to vector<32x1xf32>
    %8 = vector.extract_strided_slice %2 {offsets = [0, 1], sizes = [32, 1], strides = [1, 1]} : vector<32x4xf32> to vector<32x1xf32>
    %9 = vector.extract_strided_slice %2 {offsets = [0, 2], sizes = [32, 1], strides = [1, 1]} : vector<32x4xf32> to vector<32x1xf32>
    %10 = vector.extract_strided_slice %2 {offsets = [0, 3], sizes = [8, 1], strides = [1, 1]} : vector<32x4xf32> to vector<8x1xf32>
    %cst = arith.constant dense<0.000000e+00> : vector<32x128xf32>
    %11 = tpu.matmul %3, %0, %cst {dimension_numbers = #tpu.dot_dimension_numbers<[1], [0], [0], [1], [0, 0, 1, 1], [], []>} : vector<32x32xf32>, vector<32x128xf32>, vector<32x128xf32> -> vector<32x128xf32>
    %12 = vector.broadcast %7 : vector<32x1xf32> to vector<32x128xf32>
    %13 = arith.addf %11, %12 : vector<32x128xf32>
    %cst_5 = arith.constant 0.000000e+00 : f32
    %14 = vector.broadcast %cst_5 : f32 to vector<32x128xf32>
    %15 = arith.cmpf ogt, %13, %14 : vector<32x128xf32>
    %cst_6 = arith.constant 0.00999999977 : f32
    %16 = vector.broadcast %cst_6 : f32 to vector<32x128xf32>
    %17 = arith.mulf %16, %13 : vector<32x128xf32>
    %18 = arith.select %15, %13, %17 : vector<32x128xi1>, vector<32x128xf32>
    %cst_7 = arith.constant dense<0.000000e+00> : vector<32x128xf32>
    %19 = tpu.matmul %4, %18, %cst_7 {dimension_numbers = #tpu.dot_dimension_numbers<[1], [0], [0], [1], [0, 0, 1, 1], [], []>} : vector<32x32xf32>, vector<32x128xf32>, vector<32x128xf32> -> vector<32x128xf32>
    %20 = vector.broadcast %8 : vector<32x1xf32> to vector<32x128xf32>
    %21 = arith.addf %19, %20 : vector<32x128xf32>
    %cst_8 = arith.constant 0.000000e+00 : f32
    %22 = vector.broadcast %cst_8 : f32 to vector<32x128xf32>
    %23 = arith.cmpf ogt, %21, %22 : vector<32x128xf32>
    %cst_9 = arith.constant 0.00999999977 : f32
    %24 = vector.broadcast %cst_9 : f32 to vector<32x128xf32>
    %25 = arith.mulf %24, %21 : vector<32x128xf32>
    %26 = arith.select %23, %21, %25 : vector<32x128xi1>, vector<32x128xf32>
    %cst_10 = arith.constant dense<0.000000e+00> : vector<32x128xf32>
    %27 = tpu.matmul %5, %26, %cst_10 {dimension_numbers = #tpu.dot_dimension_numbers<[1], [0], [0], [1], [0, 0, 1, 1], [], []>} : vector<32x32xf32>, vector<32x128xf32>, vector<32x128xf32> -> vector<32x128xf32>
    %28 = vector.broadcast %9 : vector<32x1xf32> to vector<32x128xf32>
    %29 = arith.addf %27, %28 : vector<32x128xf32>
    %cst_11 = arith.constant 0.000000e+00 : f32
    %30 = vector.broadcast %cst_11 : f32 to vector<32x128xf32>
    %31 = arith.cmpf ogt, %29, %30 : vector<32x128xf32>
    %cst_12 = arith.constant 0.00999999977 : f32
    %32 = vector.broadcast %cst_12 : f32 to vector<32x128xf32>
    %33 = arith.mulf %32, %29 : vector<32x128xf32>
    %34 = arith.select %31, %29, %33 : vector<32x128xi1>, vector<32x128xf32>
    %cst_13 = arith.constant dense<0.000000e+00> : vector<8x128xf32>
    %35 = tpu.matmul %6, %34, %cst_13 {dimension_numbers = #tpu.dot_dimension_numbers<[1], [0], [0], [1], [0, 0, 1, 1], [], []>} : vector<8x32xf32>, vector<32x128xf32>, vector<8x128xf32> -> vector<8x128xf32>
    %36 = vector.broadcast %10 : vector<8x1xf32> to vector<8x128xf32>
    %37 = arith.addf %35, %36 : vector<8x128xf32>
    %cst_14 = arith.constant 0.000000e+00 : f32
    %38 = vector.broadcast %cst_14 : f32 to vector<8x128xf32>
    %39 = arith.cmpf ogt, %37, %38 : vector<8x128xf32>
    %cst_15 = arith.constant 0.00999999977 : f32
    %40 = vector.broadcast %cst_15 : f32 to vector<8x128xf32>
    %41 = arith.mulf %40, %37 : vector<8x128xf32>
    %42 = arith.select %39, %37, %41 : vector<8x128xi1>, vector<8x128xf32>
    %c0_16 = arith.constant 0 : index
    %c0_17 = arith.constant 0 : index
    %43 = vector.load %arg4[%c0_16, %c0_17] : memref<8x128xf32, #tpu.memory_space<vmem>>, vector<8x128xf32>
    tpu.vector_store %arg4[%c0_16, %c0_17], %42 {strides = array<i32>} : memref<8x128xf32, #tpu.memory_space<vmem>>, vector<8x128xf32>,
    return
  }
  func.func @transform_0(%arg0: i32) -> (i32, i32) {
    %c0_i32 = arith.constant 0 : i32
    %c0_i32_0 = arith.constant 0 : i32
    return %c0_i32, %arg0 : i32, i32
  }
  func.func @transform_1(%arg0: i32) -> (i32, i32) {
    %c0_i32 = arith.constant 0 : i32
    %c0_i32_0 = arith.constant 0 : i32
    %c0_i32_1 = arith.constant 0 : i32
    return %c0_i32, %c0_i32_0 : i32, i32
  }
  func.func @transform_2(%arg0: i32) -> (i32, i32) {
    %c0_i32 = arith.constant 0 : i32
    %c0_i32_0 = arith.constant 0 : i32
    %c0_i32_1 = arith.constant 0 : i32
    return %c0_i32, %c0_i32_0 : i32, i32
  }
  func.func @transform_3(%arg0: i32) -> (i32, i32) {
    %c0_i32 = arith.constant 0 : i32
    %c0_i32_0 = arith.constant 0 : i32
    return %c0_i32, %arg0 : i32, i32
  }
}

</mosaic_0001>

<bundles_post_ra>
// kernel: tpu_custom_call.1
= control target key start
LH: loop header
LB: loop body
LE: loop exit
PB: predicated region body
PF: predicated region fallthrough
CT: control target
= control target key end

     0   :  { %vm56_vm0 = vcmask 261120   ;;  %v642_v3 = vmov 0   ;;  %s769_s0 = inlined_call_operand.vmem [shape: f32[32,128], index: 0, kind: input, shape index: {}]   ;;  %s770_s1 = inlined_call_operand.vmem [shape: f32[104,32], index: 1, kind: input, shape index: {}]   ;;  %s771_s2 = inlined_call_operand.vmem [shape: f32[32,4], index: 2, kind: input, shape index: {}]   ;;  %s772_s3 = inlined_call_operand.hbm [shape: f32[8,128], index: 3, kind: output, shape index: {}]  }
   0x1   :  { %v18_v0 = vld [vmem:[%s769_s0 + $0x18] sm:$0xff]  ;;  %v17_v1 = vld [vmem:[%s769_s0 + $0x10] sm:$0xff]  ;;  %v19_v2 = vld [vmem:[%s770_s1] sm:$0xff]  ;;  %614 = vset.pattern.permute.xlu1 %v642_v3  ;;  %613 = vset.pattern.permute.xlu0 %v642_v3 }
   0x2   :  { %553 = vmatprep.subr.mxu0 %v18_v0  ;;  %v16_v4 = vld [vmem:[%s769_s0 + $0x8] sm:$0xff]  ;;  %561 = vmatprep.mubr.msk.f32.mxu0 %vm56_vm0, %v19_v2  ;;  %v685_v5 = vld [vmem:[%s771_s2 + $0x18] sm:$0xff]  ;;  %v15_v7 = vld [vmem:[%s769_s0] sm:$0xff] }
   0x3   :  { %554 = vmatpush3.msra.mxu0 %v18_v0  ;;  %v690_v6 = vld [vmem:[%s771_s2 + $0x8] sm:$0xff]  ;;  %53 = vperm.xlu0 %613, %v685_v5  }
   0x4   :  { %555 = vmatprep.subr.mxu0 %v17_v1 }
   0x5   :  { %556 = vmatpush3.msra.mxu0 %v17_v1 }
   0x6   :  { %8 = vsyncpa [#allocation3], 0  ;;  %557 = vmatprep.subr.mxu0 %v16_v4  ;;  %43 = vperm.xlu1 %614, %v690_v6   ;;  %v700_v8 = vld [vmem:[%s771_s2 + $0x10] sm:$0xff]  ;;  %v20_v9 = vld [vmem:[%s770_s1 + $0x8] sm:$0xff]  ;;  %v643_v14 = vmov 1   ;;  %v644_v39 = vmov 2  }
   0x7   :  { %558 = vmatpush3.msra.mxu0 %v16_v4  ;;  %v708_v10 = vld [vmem:[%s771_s2] sm:$0xff]  ;;  %v21_v11 = vld [vmem:[%s770_s1 + $0x10] sm:$0xff]  ;;  %48 = vperm.xlu0 %613, %v700_v8   ;;  %v22_v12 = vld [vmem:[%s770_s1 + $0x18] sm:$0xff]  ;;  %v645_v63 = vmov 0.0   ;;  %vm646_vm9 = vmmov 0   ;;  %v647_v0 = vmov 3  }
   0x8   :  { %559 = vmatprep.subr.mxu0 %v15_v7  ;;  %v23_v13 = vld [vmem:[%s770_s1 + $0x20] sm:$0xff]  ;;  %v24_v35 = vld [vmem:[%s770_s1 + $0x28] sm:$0xff]  ;;  %v25_v36 = vld [vmem:[%s770_s1 + $0x30] sm:$0xff]  ;;  %s648_s25 = smov [#allocation2]  }
   0x9   :  { %560 = vmatpush3.msra.mxu0 %v15_v7  ;;  %575 = vmatprep.mubr.msk.f32.mxu1 %vm56_vm0, %v23_v13  ;;  %v26_v37 = vld [vmem:[%s770_s1 + $0x38] sm:$0xff]  ;;  %v27_v38 = vld [vmem:[%s770_s1 + $0x40] sm:$0xff]  ;;  %v28_v60 = vld [vmem:[%s770_s1 + $0x48] sm:$0xff]  ;;  %s503_s26 = sshll.u32 %s648_s25, 4  ;;  %s504_s26 = int_to_ptr.vmem [resolvable:$true] %s503_s26 }
   0xa   :  { %562 = vmatmul.mubr.msk.f32.vlgmr.msra.gmra.mxu0 %vm56_vm0, %v20_v9  ;;  %38 = vperm.xlu1 %614, %v708_v10   ;;  %v29_v61 = vld [vmem:[%s770_s1 + $0x50] sm:$0xff]  ;;  %v30_v62 = vld [vmem:[%s770_s1 + $0x58] sm:$0xff]  ;;  %s620_s27 = scalar_lea.vmem %s504_s26, 128  ;;  %p625_p1 = scmp.lt.s32.totalorder %s504_s26, %s504_s26 }
   0xb   :  { %564 = vmatprep.mubr.msk.f32.mxu0 %vm56_vm0, %v21_v11  ;;  %615 = vset.pattern.permute.xlu0 %v643_v14  ;;  %p621_p0 = scmp.ne.s32.totalorder %s504_s26, %s620_s27  ;;  %p626_p2 = scmp.lt.s32.totalorder %s620_s27, %s620_s27 }
   0xc   :  { %179 = vperm.xlu0 %615, %v685_v5  }
   0xd   :  { %p627_p3 = por %p626_p2, %p625_p1 }
   0xe   :  { %565 = vmatmul.mubr.msk.f32.gmra.mxu0 %vm56_vm0, %v22_v12  ;;  %616 = vset.pattern.permute.xlu1 %v643_v14 }
   0xf   :  { %175 = vperm.xlu1 %616, %v700_v8   ;;  %589 = vmatprep.mubr.msk.f32.mxu0 %vm56_vm0, %v27_v38  ;;  %p628_p4 = pnand %p627_p3, %p621_p0 }
  0x10   :  { %167 = vperm.xlu0 %615, %v708_v10  }
  0x13   :  { %171 = vperm.xlu1 %616, %v690_v6  }
  0x14   :  { %618 = vset.pattern.permute.xlu0 %v644_v39 }
  0x15   :  { %300 = vperm.xlu0 %618, %v700_v8  }
  0x17   :  { %617 = vset.pattern.permute.xlu1 %v644_v39 }
  0x18   :  { %304 = vperm.xlu1 %617, %v685_v5  }
  0x19   :  { %619 = vset.pattern.permute.xlu0 %v647_v0 }
  0x1a   :  { %417 = vperm.xlu0 %619, %v708_v10  }
  0x1c   :  { %296 = vperm.xlu1 %617, %v690_v6  }
  0x20   :  { %292 = vperm.xlu1 %617, %v708_v10  }
  0x7e   :  { %v54_v16 = vpop.permute.xlu0 %53 }
  0x81   :  { %v44_v15 = vpop.permute.xlu1 %43 }
  0x82   :  { %v49_v23 = vpop.permute.xlu0 %48 }
  0x85   :  { %v39_v19 = vpop.permute.xlu1 %38 }
  0x87   :  { %v180_v41 = vpop.permute.xlu0 %179 }
  0x8a   :  { %v176_v40 = vpop.permute.xlu1 %175 }
  0x8b   :  { %v168_v45 = vpop.permute.xlu0 %167 }
  0x8e   :  { %v172_v43 = vpop.permute.xlu1 %171 }
  0x90   :  { %v301_v7 = vpop.permute.xlu0 %300 }
  0x93   :  { %v305_v1 = vpop.permute.xlu1 %304 }
  0x97   :  { %v297_v2 = vpop.permute.xlu1 %296 }
  0x9b   :  { %v293_v5 = vpop.permute.xlu1 %292 }
  0xca   :  { %v563_v17 = vpop.f32.mrf.mxu0 }
  0xcb   :  { %v141_v21 = vadd.f32 %v563_v17, %v44_v15 }
  0xcc   :  { %v135_v18 = vpop.f32.mrf.mxu0 }
  0xcd   :  { %v136_v25 = vadd.f32 %v135_v18, %v39_v19  ;;  %v159_v28 = vmul.f32 0.01, %v141_v21  ;;  %vm155_vm3 = vcmp.gt.f32.partialorder %v141_v21, 0.0 }
  0xce   :  { %v566_v20 = vpop.f32.mrf.mxu0 }
  0xcf   :  { %v151_v22 = vadd.f32 %v566_v20, %v54_v16  ;;  %v158_v31 = vmul.f32 0.01, %v136_v25  ;;  %vm154_vm4 = vcmp.gt.f32.partialorder %v136_v25, 0.0  ;;  %v163_v33 = vsel %vm155_vm3, %v141_v21, %v159_v28  ;;  %v31_v20 = vld [vmem:[%s770_s1 + $0x60] sm:$0xff] }
  0xd0   :  { %v145_v24 = vpop.f32.mrf.mxu0 }
  0xd1   :  { %v146_v26 = vadd.f32 %v145_v24, %v49_v23  ;;  %vm157_vm1 = vcmp.gt.f32.partialorder %v151_v22, 0.0  ;;  %v161_v27 = vmul.f32 0.01, %v151_v22  ;;  %v162_v34 = vsel %vm154_vm4, %v136_v25, %v158_v31 }
  0xd3   :  { %v160_v29 = vmul.f32 0.01, %v146_v26  ;;  %v165_v30 = vsel %vm157_vm1, %v151_v22, %v161_v27  ;;  %vm156_vm2 = vcmp.gt.f32.partialorder %v146_v26, 0.0  ;;  %v418_v22 = vpop.permute.xlu0 %417 }
  0xd4   :  { %567 = vmatprep.subr.mxu1 %v165_v30 }
  0xd5   :  { %568 = vmatpush3.msra.mxu1 %v165_v30  ;;  %v164_v32 = vsel %vm156_vm2, %v146_v26, %v160_v29 }
  0xd6   :  { %569 = vmatprep.subr.mxu1 %v164_v32 }
  0xd7   :  { %570 = vmatpush3.msra.mxu1 %v164_v32 }
  0xd8   :  { %571 = vmatprep.subr.mxu1 %v163_v33 }
  0xd9   :  { %572 = vmatpush3.msra.mxu1 %v163_v33 }
  0xda   :  { %573 = vmatprep.subr.mxu1 %v162_v34 }
  0xdb   :  { %574 = vmatpush3.msra.mxu1 %v162_v34 }
  0xdc   :  { %576 = vmatmul.mubr.msk.f32.vlgmr.msra.gmra.mxu1 %vm56_vm0, %v24_v35  ;;  %595 = vmatprep.subr.mxu1 %v645_v63 }
  0xdd   :  { %578 = vmatprep.mubr.msk.f32.mxu1 %vm56_vm0, %v25_v36 }
  0xe0   :  { %579 = vmatmul.mubr.msk.f32.gmra.mxu1 %vm56_vm0, %v26_v37 }
  0xe1   :  { %603 = vmatprep.mubr.msk.f32.mxu1 %vm646_vm9, %v645_v63 }
 0x19c   :  { %v577_v42 = vpop.f32.mrf.mxu1 }
 0x19d   :  { %v266_v47 = vadd.f32 %v577_v42, %v172_v43 }
 0x19e   :  { %v260_v44 = vpop.f32.mrf.mxu1 }
 0x19f   :  { %v261_v50 = vadd.f32 %v260_v44, %v168_v45  ;;  %v284_v53 = vmul.f32 0.01, %v266_v47  ;;  %vm280_vm7 = vcmp.gt.f32.partialorder %v266_v47, 0.0 }
 0x1a0   :  { %v580_v46 = vpop.f32.mrf.mxu1 }
 0x1a1   :  { %v276_v48 = vadd.f32 %v580_v46, %v180_v41  ;;  %v283_v56 = vmul.f32 0.01, %v261_v50  ;;  %vm279_vm8 = vcmp.gt.f32.partialorder %v261_v50, 0.0  ;;  %v288_v58 = vsel %vm280_vm7, %v266_v47, %v284_v53 }
 0x1a2   :  { %v270_v49 = vpop.f32.mrf.mxu1 }
 0x1a3   :  { %v286_v51 = vmul.f32 0.01, %v276_v48  ;;  %v271_v52 = vadd.f32 %v270_v49, %v176_v40  ;;  %vm282_vm5 = vcmp.gt.f32.partialorder %v276_v48, 0.0  ;;  %v287_v59 = vsel %vm279_vm8, %v261_v50, %v283_v56 }
 0x1a5   :  { %v285_v54 = vmul.f32 0.01, %v271_v52  ;;  %v290_v55 = vsel %vm282_vm5, %v276_v48, %v286_v51  ;;  %vm281_vm6 = vcmp.gt.f32.partialorder %v271_v52, 0.0 }
 0x1a6   :  { %581 = vmatprep.subr.mxu0 %v290_v55 }
 0x1a7   :  { %582 = vmatpush3.msra.mxu0 %v290_v55  ;;  %v289_v57 = vsel %vm281_vm6, %v271_v52, %v285_v54 }
 0x1a8   :  { %583 = vmatprep.subr.mxu0 %v289_v57 }
 0x1a9   :  { %584 = vmatpush3.msra.mxu0 %v289_v57 }
 0x1aa   :  { %585 = vmatprep.subr.mxu0 %v288_v58 }
 0x1ab   :  { %586 = vmatpush3.msra.mxu0 %v288_v58 }
 0x1ac   :  { %587 = vmatprep.subr.mxu0 %v287_v59 }
 0x1ad   :  { %588 = vmatpush3.msra.mxu0 %v287_v59 }
 0x1ae   :  { %590 = vmatmul.mubr.msk.f32.vlgmr.msra.gmra.mxu0 %vm56_vm0, %v28_v60 }
 0x1af   :  { %592 = vmatprep.mubr.msk.f32.mxu0 %vm56_vm0, %v29_v61 }
 0x1b2   :  { %593 = vmatmul.mubr.msk.f32.gmra.mxu0 %vm56_vm0, %v30_v62 }
 0x26e   :  { %v591_v3 = vpop.f32.mrf.mxu0 }
 0x26f   :  { %v391_v8 = vadd.f32 %v591_v3, %v297_v2 }
 0x270   :  { %v385_v4 = vpop.f32.mrf.mxu0 }
 0x271   :  { %v386_v12 = vadd.f32 %v385_v4, %v293_v5  ;;  %v409_v15 = vmul.f32 0.01, %v391_v8  ;;  %vm405_vm12 = vcmp.gt.f32.partialorder %v391_v8, 0.0 }
 0x272   :  { %v594_v6 = vpop.f32.mrf.mxu0 }
 0x273   :  { %v401_v9 = vadd.f32 %v594_v6, %v305_v1  ;;  %v408_v10 = vmul.f32 0.01, %v386_v12  ;;  %vm404_vm13 = vcmp.gt.f32.partialorder %v386_v12, 0.0  ;;  %v413_v19 = vsel %vm405_vm12, %v391_v8, %v409_v15 }
 0x274   :  { %v395_v11 = vpop.f32.mrf.mxu0 }
 0x275   :  { %vm407_vm10 = vcmp.gt.f32.partialorder %v401_v9, 0.0  ;;  %v411_v13 = vmul.f32 0.01, %v401_v9  ;;  %v396_v14 = vadd.f32 %v395_v11, %v301_v7  ;;  %v412_v21 = vsel %vm404_vm13, %v386_v12, %v408_v10 }
 0x277   :  { %vm406_vm11 = vcmp.gt.f32.partialorder %v396_v14, 0.0  ;;  %v410_v16 = vmul.f32 0.01, %v396_v14  ;;  %v415_v17 = vsel %vm407_vm10, %v401_v9, %v411_v13 }
 0x278   :  { %596 = vmatpush3.msra.mxu1 %v415_v17 }
 0x279   :  { %597 = vmatprep.subr.mxu1 %v645_v63  ;;  %v414_v18 = vsel %vm406_vm11, %v396_v14, %v410_v16 }
 0x27a   :  { %598 = vmatpush3.msra.mxu1 %v414_v18 }
 0x27b   :  { %599 = vmatprep.subr.mxu1 %v645_v63 }
 0x27c   :  { %600 = vmatpush3.msra.mxu1 %v413_v19 }
 0x27d   :  { %601 = vmatprep.subr.mxu1 %v645_v63 }
 0x27e   :  { %602 = vmatpush3.msra.mxu1 %v412_v21 }
 0x27f   :  { %604 = vmatmul.mubr.msk.f32.vlgmr.msra.gmra.mxu1 %vm56_vm0, %v31_v20 }
 0x33f   :  { %v489_v23 = vpop.f32.mrf.mxu1 }
 0x340   :  { %v490_v24 = vadd.f32 %v489_v23, %v418_v22 }
 0x341   :  { %v605_v25 = vpop.f32.mrf.mxu1 }
 0x342   :  { %v494_v26 = vmul.f32 0.01, %v490_v24  ;;  %vm493_vm14 = vcmp.gt.f32.partialorder %v490_v24, 0.0 }
 0x344   :  { %v495_v27 = vsel %vm493_vm14, %v490_v24, %v494_v26 }
 0x345   :  { %496 = vst [vmem:[#allocation2] sm:$0xff] %v495_v27 }
 0x346   :  { %631 = shalt.err (!%p628_p4)
}
 0x347   :  { %506 = dma.vmem_to_hbm [thread:$0]  %s504_s26, 128, %s772_s3, [#allocation3]  }
 0x348   :  { %640 = dma.done.wait [#allocation3], 128  }
 0x349   :  { %641 = vsyncadd [#allocation3], 4294967168 }
 0x34a   :  { %510 = vsyncpa [#allocation3], 1 }

</bundles_post_ra>
